<compile_context>
chip_gen: v5e
topology: v5e:2x2
jax: 0.10.0
libtpu: 0.0.40
codegen_flags: <defaults>
</compile_context>

<pallas_src>
import math
from functools import partial

import jax
import jax.numpy as jnp
from jax.experimental import pallas as pl
from jax.experimental.pallas import tpu as pltpu


def _round_up(x, m):
    return ((x + m - 1) // m) * m


def _device_kind():
    try:
        return jax.devices()[0].device_kind.lower()
    except Exception:
        return ""


def _num_tensorcores():
    """TensorCores reachable by one pallas_call via 'parallel' grid sharding."""
    try:
        info = pltpu.get_tpu_info()
        for name in ("num_cores", "core_count", "num_tensorcores"):
            v = getattr(info, name, None)
            if isinstance(v, int) and v > 0:
                return v
    except Exception:
        pass
    kind = _device_kind()
    if "v7" in kind or "v4" in kind:
        return 2          # v7x: 2 TC/chip; v4 megacore: 2 TC/device
    if "v5" in kind and "lite" not in kind and "v5e" not in kind:
        return 2          # v5p megacore
    return 1              # v5e / v6e (safe default: never split needlessly)


def _default_block_bytes():
    # ~8 MiB amortizes the ~0.35 us per-step overhead on v5e/v6e; v7x's faster
    # HBM (~3.2 TB/s) wants slightly larger blocks.  2x double-buffered input
    # plus output stays inside every generation's VMEM with the explicit limit.
    return (12 << 20) if "v7" in _device_kind() else (8 << 20)


def _pick_tiling(n_rows, row_bytes, num_tc, target_block_bytes):
    """Choose (rows_per_block, num_blocks) for the 1-D row grid."""
    tr = max(8, (target_block_bytes // max(row_bytes, 1)) // 8 * 8)
    if num_tc > 1:
        # Give each TensorCore work (ideally >= 2 pipeline steps each), but
        # never shrink blocks below the 8-row sublane granule.
        want = 2 * num_tc if n_rows >= 16 * num_tc else num_tc
        tr = min(tr, max(8, _round_up(pl.cdiv(n_rows, want), 8)))
    if tr >= n_rows:
        return n_rows, 1          # single full block; no forced split on 1 TC
    nb = pl.cdiv(n_rows, tr)
    if num_tc > 1 and nb % num_tc:
        # Round block count up to a multiple of the core count for an even
        # split (best effort: 8-row granularity may leave a small imbalance).
        nb = _round_up(nb, num_tc)
        tr = max(8, _round_up(pl.cdiv(n_rows, nb), 8))
        nb = pl.cdiv(n_rows, tr)
    return tr, nb


def _logvar_rows_kernel(x_ref, o_ref, *, t, seg):
    """(tr, seg*t) block of rows -> (tr, seg) unbiased, clamped log-variances."""
    x = x_ref[...].astype(jnp.float32)
    inv_n = 1.0 / t
    # torch.var (correction=1) of a single sample is NaN; propagate it.
    inv_nm1 = (1.0 / (t - 1)) if t > 1 else float("nan")
    for g in range(seg):                      # static unroll over lane segments
        xs = x[:, g * t:(g + 1) * t]
        mean = jnp.sum(xs, axis=-1, keepdims=True) * inv_n
        d = xs - mean
        var = jnp.sum(d * d, axis=-1, keepdims=True) * inv_nm1
        logvar = jnp.log(jnp.clip(var, 1e-6, 1e6))
        o_ref[:, g:g + 1] = logvar.astype(o_ref.dtype)


def logvar_layer(x, dim=3, *, target_block_bytes=None):
    """Pallas TPU implementation of LogVarLayer(dim).forward."""
    nd = x.ndim
    dim = dim % nd
    moved = dim != nd - 1
    # TODO(synk): sublane-axis (dim == nd-2) in-kernel reduction to avoid this
    # materialized transpose; FBCNet always reduces the last axis.
    xm = jnp.moveaxis(x, dim, -1) if moved else x

    lead = xm.shape[:-1]
    T = xm.shape[-1]
    R = math.prod(lead) if lead else 1
    if R == 0 or T == 0:
        fill = jnp.nan if (T == 0 and R > 0) else 0.0
        out = jnp.full(lead + (1,), fill, dtype=x.dtype)
        return jnp.moveaxis(out, -1, dim) if moved else out

    x2 = xm.reshape(R, T)

    # Exact lane packing for small T: G consecutive rows share one lane-row of
    # width G*T (free row-major reshape; no transpose, no padding copy).
    G = 1
    if T < 128:
        for g in range(min(128 // T, 32), 1, -1):   # cap the per-segment unroll
            if R % g == 0:
                G = g
                break
    n_rows, width = R // G, G * T
    xk = x2 if G == 1 else x2.reshape(n_rows, width)

    itemsize = jnp.dtype(x.dtype).itemsize
    row_bytes = _round_up(width, 128) * itemsize        # VMEM lane padding
    if target_block_bytes is None:
        target_block_bytes = _default_block_bytes()
    num_tc = _num_tensorcores()
    tr, nb = _pick_tiling(n_rows, row_bytes, num_tc, target_block_bytes)

    out_row_bytes = _round_up(G, 128) * itemsize
    vmem_limit = 2 * tr * row_bytes + 2 * tr * out_row_bytes + (2 << 20)
    vmem_limit = int(min(max(vmem_limit, 16 << 20), 100 << 20))

    outk = pl.pallas_call(
        partial(_logvar_rows_kernel, t=T, seg=G),
        out_shape=jax.ShapeDtypeStruct((n_rows, G), x.dtype),
        grid_spec=pl.GridSpec(
            grid=(nb,),   # ragged last block: OOB reads harmless, OOB writes masked
            in_specs=[pl.BlockSpec((tr, width), lambda i: (i, 0))],
            out_specs=pl.BlockSpec((tr, G), lambda i: (i, 0)),
        ),
        compiler_params=pltpu.CompilerParams(
            dimension_semantics=("parallel",),
            vmem_limit_bytes=vmem_limit,
        ),
    )(xk)

    out = outk.reshape(lead + (1,))     # (n_rows, G) -> (R,) -> keepdim shape
    if moved:
        out = jnp.moveaxis(out, -1, dim)
    return out


def _reference(x, dim):
    # Pure-JAX reference matching torch.var(dim, keepdim=True) (unbiased).
    var = jnp.var(x.astype(jnp.float32), axis=dim, keepdims=True, ddof=1)
    return jnp.log(jnp.clip(var, 1e-6, 1e6)).astype(x.dtype)


if __name__ == "__main__":
    key = jax.random.PRNGKey(0)
    k1, k2, k3, k4, k5 = jax.random.split(key, 5)

    # 1) Canonical FBCNet-style input (B, C, S, T), dim=3 -> packed path (G=8).
    B, C, S, T = 2, 4, 16, 16
    x = jax.random.normal(k1, (B, C, S, T), dtype=jnp.float32) * 1.7 + 0.5
    out = jax.block_until_ready(logvar_layer(x, dim=3))
    ref = _reference(x, dim=3)
    assert out.shape == (B, C, S, 1), out.shape
    assert jnp.allclose(out, ref, atol=1e-5, rtol=1e-5), float(
        jnp.max(jnp.abs(out - ref)))

    # 2) Non-power-of-two widths -> packed path with G=5, width=120.
    x2 = jax.random.normal(k2, (2, 3, 5, 24), dtype=jnp.float32)
    out2 = jax.block_until_ready(logvar_layer(x2, dim=3))
    ref2 = _reference(x2, dim=3)
    assert out2.shape == (2, 3, 5, 1), out2.shape
    assert jnp.allclose(out2, ref2, atol=1e-5, rtol=1e-5), float(
        jnp.max(jnp.abs(out2 - ref2)))

    # 3) Reduction over a non-last axis (dim=2) -> wrapper moveaxis path.
    x3 = jax.random.normal(k3, (2, 4, 16, 16), dtype=jnp.float32)
    out3 = jax.block_until_ready(logvar_layer(x3, dim=2))
    ref3 = _reference(x3, dim=2)
    assert out3.shape == (2, 4, 1, 16), out3.shape
    assert jnp.allclose(out3, ref3, atol=1e-5, rtol=1e-5), float(
        jnp.max(jnp.abs(out3 - ref3)))

    # 4) Large-T unpacked path with a forced multi-block grid and a ragged
    #    (masked) last block: 105 rows, 16-row blocks -> 7 blocks, last has 9.
    x4 = jax.random.normal(k4, (3, 5, 7, 200), dtype=jnp.float32)
    out4 = jax.block_until_ready(logvar_layer(x4, dim=3, target_block_bytes=16 * 1024))
    ref4 = _reference(x4, dim=3)
    assert out4.shape == (3, 5, 7, 1), out4.shape
    assert jnp.allclose(out4, ref4, atol=1e-5, rtol=1e-5), float(
        jnp.max(jnp.abs(out4 - ref4)))

    # 5) Packed path (G=8) with a ragged last block: 25 packed rows, 8-row blocks.
    x5 = jax.random.normal(k5, (4, 5, 10, 16), dtype=jnp.float32)
    out5 = jax.block_until_ready(logvar_layer(x5, dim=3, target_block_bytes=4 * 1024))
    ref5 = _reference(x5, dim=3)
    assert out5.shape == (4, 5, 10, 1), out5.shape
    assert jnp.allclose(out5, ref5, atol=1e-5, rtol=1e-5), float(
        jnp.max(jnp.abs(out5 - ref5)))

    print("KERNEL_OK")
</pallas_src>

<mosaic_0001>
module attributes {stable_mosaic.version = 11 : i64} {
  func.func @_logvar_rows_kernel(%arg0: i32, %arg1: memref<16x128xf32, #tpu.memory_space<vmem>>, %arg2: memref<16x8xf32, #tpu.memory_space<vmem>>) attributes {dimension_semantics = [#tpu.dimension_semantics<parallel>], iteration_bounds = array<i64: 1>, scalar_prefetch = 0 : i64, scratch_operands = 0 : i64, tpu.core_type = #tpu.core_type<tc>, window_params = [{transform_indices = @transform_0, window_bounds = array<i64: 16, 128>}, {transform_indices = @transform_1, window_bounds = array<i64: 16, 8>}]} {
    %c0 = arith.constant 0 : index
    %c0_0 = arith.constant 0 : index
    %0 = vector.load %arg1[%c0, %c0_0] : memref<16x128xf32, #tpu.memory_space<vmem>>, vector<16x128xf32>
    %1 = vector.extract_strided_slice %0 {offsets = [0, 0], sizes = [16, 16], strides = [1, 1]} : vector<16x128xf32> to vector<16x16xf32>
    %cst = arith.constant dense<0.000000e+00> : vector<16xf32>
    %2 = vector.multi_reduction <add>, %1, %cst [1] : vector<16x16xf32> to vector<16xf32>
    %3 = vector.shape_cast %2 : vector<16xf32> to vector<16x1xf32>
    %cst_1 = arith.constant 6.250000e-02 : f32
    %4 = vector.broadcast %cst_1 : f32 to vector<16x1xf32>
    %5 = arith.mulf %3, %4 : vector<16x1xf32>
    %6 = vector.broadcast %5 : vector<16x1xf32> to vector<16x16xf32>
    %7 = arith.subf %1, %6 : vector<16x16xf32>
    %8 = arith.mulf %7, %7 : vector<16x16xf32>
    %cst_2 = arith.constant dense<0.000000e+00> : vector<16xf32>
    %9 = vector.multi_reduction <add>, %8, %cst_2 [1] : vector<16x16xf32> to vector<16xf32>
    %10 = vector.shape_cast %9 : vector<16xf32> to vector<16x1xf32>
    %cst_3 = arith.constant 0.0666666701 : f32
    %11 = vector.broadcast %cst_3 : f32 to vector<16x1xf32>
    %12 = arith.mulf %10, %11 : vector<16x1xf32>
    %cst_4 = arith.constant 9.99999997E-7 : f32
    %cst_5 = arith.constant 1.000000e+06 : f32
    %13 = vector.broadcast %cst_4 : f32 to vector<16x1xf32>
    %14 = arith.maximumf %13, %12 : vector<16x1xf32>
    %15 = vector.broadcast %cst_5 : f32 to vector<16x1xf32>
    %16 = arith.minimumf %15, %14 : vector<16x1xf32>
    %17 = math.log %16 : vector<16x1xf32>
    %c0_6 = arith.constant 0 : index
    %c0_7 = arith.constant 0 : index
    %18 = vector.load %arg2[%c0_6, %c0_7] : memref<16x8xf32, #tpu.memory_space<vmem>>, vector<16x1xf32>
    tpu.vector_store %arg2[%c0_6, %c0_7], %17 {strides = array<i32>} : memref<16x8xf32, #tpu.memory_space<vmem>>, vector<16x1xf32>,
    %19 = vector.extract_strided_slice %0 {offsets = [0, 16], sizes = [16, 16], strides = [1, 1]} : vector<16x128xf32> to vector<16x16xf32>
    %cst_8 = arith.constant dense<0.000000e+00> : vector<16xf32>
    %20 = vector.multi_reduction <add>, %19, %cst_8 [1] : vector<16x16xf32> to vector<16xf32>
    %21 = vector.shape_cast %20 : vector<16xf32> to vector<16x1xf32>
    %cst_9 = arith.constant 6.250000e-02 : f32
    %22 = vector.broadcast %cst_9 : f32 to vector<16x1xf32>
    %23 = arith.mulf %21, %22 : vector<16x1xf32>
    %24 = vector.broadcast %23 : vector<16x1xf32> to vector<16x16xf32>
    %25 = arith.subf %19, %24 : vector<16x16xf32>
    %26 = arith.mulf %25, %25 : vector<16x16xf32>
    %cst_10 = arith.constant dense<0.000000e+00> : vector<16xf32>
    %27 = vector.multi_reduction <add>, %26, %cst_10 [1] : vector<16x16xf32> to vector<16xf32>
    %28 = vector.shape_cast %27 : vector<16xf32> to vector<16x1xf32>
    %cst_11 = arith.constant 0.0666666701 : f32
    %29 = vector.broadcast %cst_11 : f32 to vector<16x1xf32>
    %30 = arith.mulf %28, %29 : vector<16x1xf32>
    %cst_12 = arith.constant 9.99999997E-7 : f32
    %cst_13 = arith.constant 1.000000e+06 : f32
    %31 = vector.broadcast %cst_12 : f32 to vector<16x1xf32>
    %32 = arith.maximumf %31, %30 : vector<16x1xf32>
    %33 = vector.broadcast %cst_13 : f32 to vector<16x1xf32>
    %34 = arith.minimumf %33, %32 : vector<16x1xf32>
    %35 = math.log %34 : vector<16x1xf32>
    %c0_14 = arith.constant 0 : index
    %c1 = arith.constant 1 : index
    %36 = vector.load %arg2[%c0_14, %c1] : memref<16x8xf32, #tpu.memory_space<vmem>>, vector<16x1xf32>
    tpu.vector_store %arg2[%c0_14, %c1], %35 {strides = array<i32>} : memref<16x8xf32, #tpu.memory_space<vmem>>, vector<16x1xf32>,
    %37 = vector.extract_strided_slice %0 {offsets = [0, 32], sizes = [16, 16], strides = [1, 1]} : vector<16x128xf32> to vector<16x16xf32>
    %cst_15 = arith.constant dense<0.000000e+00> : vector<16xf32>
    %38 = vector.multi_reduction <add>, %37, %cst_15 [1] : vector<16x16xf32> to vector<16xf32>
    %39 = vector.shape_cast %38 : vector<16xf32> to vector<16x1xf32>
    %cst_16 = arith.constant 6.250000e-02 : f32
    %40 = vector.broadcast %cst_16 : f32 to vector<16x1xf32>
    %41 = arith.mulf %39, %40 : vector<16x1xf32>
    %42 = vector.broadcast %41 : vector<16x1xf32> to vector<16x16xf32>
    %43 = arith.subf %37, %42 : vector<16x16xf32>
    %44 = arith.mulf %43, %43 : vector<16x16xf32>
    %cst_17 = arith.constant dense<0.000000e+00> : vector<16xf32>
    %45 = vector.multi_reduction <add>, %44, %cst_17 [1] : vector<16x16xf32> to vector<16xf32>
    %46 = vector.shape_cast %45 : vector<16xf32> to vector<16x1xf32>
    %cst_18 = arith.constant 0.0666666701 : f32
    %47 = vector.broadcast %cst_18 : f32 to vector<16x1xf32>
    %48 = arith.mulf %46, %47 : vector<16x1xf32>
    %cst_19 = arith.constant 9.99999997E-7 : f32
    %cst_20 = arith.constant 1.000000e+06 : f32
    %49 = vector.broadcast %cst_19 : f32 to vector<16x1xf32>
    %50 = arith.maximumf %49, %48 : vector<16x1xf32>
    %51 = vector.broadcast %cst_20 : f32 to vector<16x1xf32>
    %52 = arith.minimumf %51, %50 : vector<16x1xf32>
    %53 = math.log %52 : vector<16x1xf32>
    %c0_21 = arith.constant 0 : index
    %c2 = arith.constant 2 : index
    %54 = vector.load %arg2[%c0_21, %c2] : memref<16x8xf32, #tpu.memory_space<vmem>>, vector<16x1xf32>
    tpu.vector_store %arg2[%c0_21, %c2], %53 {strides = array<i32>} : memref<16x8xf32, #tpu.memory_space<vmem>>, vector<16x1xf32>,
    %55 = vector.extract_strided_slice %0 {offsets = [0, 48], sizes = [16, 16], strides = [1, 1]} : vector<16x128xf32> to vector<16x16xf32>
    %cst_22 = arith.constant dense<0.000000e+00> : vector<16xf32>
    %56 = vector.multi_reduction <add>, %55, %cst_22 [1] : vector<16x16xf32> to vector<16xf32>
    %57 = vector.shape_cast %56 : vector<16xf32> to vector<16x1xf32>
    %cst_23 = arith.constant 6.250000e-02 : f32
    %58 = vector.broadcast %cst_23 : f32 to vector<16x1xf32>
    %59 = arith.mulf %57, %58 : vector<16x1xf32>
    %60 = vector.broadcast %59 : vector<16x1xf32> to vector<16x16xf32>
    %61 = arith.subf %55, %60 : vector<16x16xf32>
    %62 = arith.mulf %61, %61 : vector<16x16xf32>
    %cst_24 = arith.constant dense<0.000000e+00> : vector<16xf32>
    %63 = vector.multi_reduction <add>, %62, %cst_24 [1] : vector<16x16xf32> to vector<16xf32>
    %64 = vector.shape_cast %63 : vector<16xf32> to vector<16x1xf32>
    %cst_25 = arith.constant 0.0666666701 : f32
    %65 = vector.broadcast %cst_25 : f32 to vector<16x1xf32>
    %66 = arith.mulf %64, %65 : vector<16x1xf32>
    %cst_26 = arith.constant 9.99999997E-7 : f32
    %cst_27 = arith.constant 1.000000e+06 : f32
    %67 = vector.broadcast %cst_26 : f32 to vector<16x1xf32>
    %68 = arith.maximumf %67, %66 : vector<16x1xf32>
    %69 = vector.broadcast %cst_27 : f32 to vector<16x1xf32>
    %70 = arith.minimumf %69, %68 : vector<16x1xf32>
    %71 = math.log %70 : vector<16x1xf32>
    %c0_28 = arith.constant 0 : index
    %c3 = arith.constant 3 : index
    %72 = vector.load %arg2[%c0_28, %c3] : memref<16x8xf32, #tpu.memory_space<vmem>>, vector<16x1xf32>
    tpu.vector_store %arg2[%c0_28, %c3], %71 {strides = array<i32>} : memref<16x8xf32, #tpu.memory_space<vmem>>, vector<16x1xf32>,
    %73 = vector.extract_strided_slice %0 {offsets = [0, 64], sizes = [16, 16], strides = [1, 1]} : vector<16x128xf32> to vector<16x16xf32>
    %cst_29 = arith.constant dense<0.000000e+00> : vector<16xf32>
    %74 = vector.multi_reduction <add>, %73, %cst_29 [1] : vector<16x16xf32> to vector<16xf32>
    %75 = vector.shape_cast %74 : vector<16xf32> to vector<16x1xf32>
    %cst_30 = arith.constant 6.250000e-02 : f32
    %76 = vector.broadcast %cst_30 : f32 to vector<16x1xf32>
    %77 = arith.mulf %75, %76 : vector<16x1xf32>
    %78 = vector.broadcast %77 : vector<16x1xf32> to vector<16x16xf32>
    %79 = arith.subf %73, %78 : vector<16x16xf32>
    %80 = arith.mulf %79, %79 : vector<16x16xf32>
    %cst_31 = arith.constant dense<0.000000e+00> : vector<16xf32>
    %81 = vector.multi_reduction <add>, %80, %cst_31 [1] : vector<16x16xf32> to vector<16xf32>
    %82 = vector.shape_cast %81 : vector<16xf32> to vector<16x1xf32>
    %cst_32 = arith.constant 0.0666666701 : f32
    %83 = vector.broadcast %cst_32 : f32 to vector<16x1xf32>
    %84 = arith.mulf %82, %83 : vector<16x1xf32>
    %cst_33 = arith.constant 9.99999997E-7 : f32
    %cst_34 = arith.constant 1.000000e+06 : f32
    %85 = vector.broadcast %cst_33 : f32 to vector<16x1xf32>
    %86 = arith.maximumf %85, %84 : vector<16x1xf32>
    %87 = vector.broadcast %cst_34 : f32 to vector<16x1xf32>
    %88 = arith.minimumf %87, %86 : vector<16x1xf32>
    %89 = math.log %88 : vector<16x1xf32>
    %c0_35 = arith.constant 0 : index
    %c4 = arith.constant 4 : index
    %90 = vector.load %arg2[%c0_35, %c4] : memref<16x8xf32, #tpu.memory_space<vmem>>, vector<16x1xf32>
    tpu.vector_store %arg2[%c0_35, %c4], %89 {strides = array<i32>} : memref<16x8xf32, #tpu.memory_space<vmem>>, vector<16x1xf32>,
    %91 = vector.extract_strided_slice %0 {offsets = [0, 80], sizes = [16, 16], strides = [1, 1]} : vector<16x128xf32> to vector<16x16xf32>
    %cst_36 = arith.constant dense<0.000000e+00> : vector<16xf32>
    %92 = vector.multi_reduction <add>, %91, %cst_36 [1] : vector<16x16xf32> to vector<16xf32>
    %93 = vector.shape_cast %92 : vector<16xf32> to vector<16x1xf32>
    %cst_37 = arith.constant 6.250000e-02 : f32
    %94 = vector.broadcast %cst_37 : f32 to vector<16x1xf32>
    %95 = arith.mulf %93, %94 : vector<16x1xf32>
    %96 = vector.broadcast %95 : vector<16x1xf32> to vector<16x16xf32>
    %97 = arith.subf %91, %96 : vector<16x16xf32>
    %98 = arith.mulf %97, %97 : vector<16x16xf32>
    %cst_38 = arith.constant dense<0.000000e+00> : vector<16xf32>
    %99 = vector.multi_reduction <add>, %98, %cst_38 [1] : vector<16x16xf32> to vector<16xf32>
    %100 = vector.shape_cast %99 : vector<16xf32> to vector<16x1xf32>
    %cst_39 = arith.constant 0.0666666701 : f32
    %101 = vector.broadcast %cst_39 : f32 to vector<16x1xf32>
    %102 = arith.mulf %100, %101 : vector<16x1xf32>
    %cst_40 = arith.constant 9.99999997E-7 : f32
    %cst_41 = arith.constant 1.000000e+06 : f32
    %103 = vector.broadcast %cst_40 : f32 to vector<16x1xf32>
    %104 = arith.maximumf %103, %102 : vector<16x1xf32>
    %105 = vector.broadcast %cst_41 : f32 to vector<16x1xf32>
    %106 = arith.minimumf %105, %104 : vector<16x1xf32>
    %107 = math.log %106 : vector<16x1xf32>
    %c0_42 = arith.constant 0 : index
    %c5 = arith.constant 5 : index
    %108 = vector.load %arg2[%c0_42, %c5] : memref<16x8xf32, #tpu.memory_space<vmem>>, vector<16x1xf32>
    tpu.vector_store %arg2[%c0_42, %c5], %107 {strides = array<i32>} : memref<16x8xf32, #tpu.memory_space<vmem>>, vector<16x1xf32>,
    %109 = vector.extract_strided_slice %0 {offsets = [0, 96], sizes = [16, 16], strides = [1, 1]} : vector<16x128xf32> to vector<16x16xf32>
    %cst_43 = arith.constant dense<0.000000e+00> : vector<16xf32>
    %110 = vector.multi_reduction <add>, %109, %cst_43 [1] : vector<16x16xf32> to vector<16xf32>
    %111 = vector.shape_cast %110 : vector<16xf32> to vector<16x1xf32>
    %cst_44 = arith.constant 6.250000e-02 : f32
    %112 = vector.broadcast %cst_44 : f32 to vector<16x1xf32>
    %113 = arith.mulf %111, %112 : vector<16x1xf32>
    %114 = vector.broadcast %113 : vector<16x1xf32> to vector<16x16xf32>
    %115 = arith.subf %109, %114 : vector<16x16xf32>
    %116 = arith.mulf %115, %115 : vector<16x16xf32>
    %cst_45 = arith.constant dense<0.000000e+00> : vector<16xf32>
    %117 = vector.multi_reduction <add>, %116, %cst_45 [1] : vector<16x16xf32> to vector<16xf32>
    %118 = vector.shape_cast %117 : vector<16xf32> to vector<16x1xf32>
    %cst_46 = arith.constant 0.0666666701 : f32
    %119 = vector.broadcast %cst_46 : f32 to vector<16x1xf32>
    %120 = arith.mulf %118, %119 : vector<16x1xf32>
    %cst_47 = arith.constant 9.99999997E-7 : f32
    %cst_48 = arith.constant 1.000000e+06 : f32
    %121 = vector.broadcast %cst_47 : f32 to vector<16x1xf32>
    %122 = arith.maximumf %121, %120 : vector<16x1xf32>
    %123 = vector.broadcast %cst_48 : f32 to vector<16x1xf32>
    %124 = arith.minimumf %123, %122 : vector<16x1xf32>
    %125 = math.log %124 : vector<16x1xf32>
    %c0_49 = arith.constant 0 : index
    %c6 = arith.constant 6 : index
    %126 = vector.load %arg2[%c0_49, %c6] : memref<16x8xf32, #tpu.memory_space<vmem>>, vector<16x1xf32>
    tpu.vector_store %arg2[%c0_49, %c6], %125 {strides = array<i32>} : memref<16x8xf32, #tpu.memory_space<vmem>>, vector<16x1xf32>,
    %127 = vector.extract_strided_slice %0 {offsets = [0, 112], sizes = [16, 16], strides = [1, 1]} : vector<16x128xf32> to vector<16x16xf32>
    %cst_50 = arith.constant dense<0.000000e+00> : vector<16xf32>
    %128 = vector.multi_reduction <add>, %127, %cst_50 [1] : vector<16x16xf32> to vector<16xf32>
    %129 = vector.shape_cast %128 : vector<16xf32> to vector<16x1xf32>
    %cst_51 = arith.constant 6.250000e-02 : f32
    %130 = vector.broadcast %cst_51 : f32 to vector<16x1xf32>
    %131 = arith.mulf %129, %130 : vector<16x1xf32>
    %132 = vector.broadcast %131 : vector<16x1xf32> to vector<16x16xf32>
    %133 = arith.subf %127, %132 : vector<16x16xf32>
    %134 = arith.mulf %133, %133 : vector<16x16xf32>
    %cst_52 = arith.constant dense<0.000000e+00> : vector<16xf32>
    %135 = vector.multi_reduction <add>, %134, %cst_52 [1] : vector<16x16xf32> to vector<16xf32>
    %136 = vector.shape_cast %135 : vector<16xf32> to vector<16x1xf32>
    %cst_53 = arith.constant 0.0666666701 : f32
    %137 = vector.broadcast %cst_53 : f32 to vector<16x1xf32>
    %138 = arith.mulf %136, %137 : vector<16x1xf32>
    %cst_54 = arith.constant 9.99999997E-7 : f32
    %cst_55 = arith.constant 1.000000e+06 : f32
    %139 = vector.broadcast %cst_54 : f32 to vector<16x1xf32>
    %140 = arith.maximumf %139, %138 : vector<16x1xf32>
    %141 = vector.broadcast %cst_55 : f32 to vector<16x1xf32>
    %142 = arith.minimumf %141, %140 : vector<16x1xf32>
    %143 = math.log %142 : vector<16x1xf32>
    %c0_56 = arith.constant 0 : index
    %c7 = arith.constant 7 : index
    %144 = vector.load %arg2[%c0_56, %c7] : memref<16x8xf32, #tpu.memory_space<vmem>>, vector<16x1xf32>
    tpu.vector_store %arg2[%c0_56, %c7], %143 {strides = array<i32>} : memref<16x8xf32, #tpu.memory_space<vmem>>, vector<16x1xf32>,
    return
  }
  func.func @transform_0(%arg0: i32) -> (i32, i32) {
    %c0_i32 = arith.constant 0 : i32
    %c0_i32_0 = arith.constant 0 : i32
    return %arg0, %c0_i32 : i32, i32
  }
  func.func @transform_1(%arg0: i32) -> (i32, i32) {
    %c0_i32 = arith.constant 0 : i32
    %c0_i32_0 = arith.constant 0 : i32
    return %arg0, %c0_i32 : i32, i32
  }
}

</mosaic_0001>

<bundles_post_ra>
// kernel: tpu_custom_call.1
= control target key start
LH: loop header
LB: loop body
LE: loop exit
PB: predicated region body
PF: predicated region fallthrough
CT: control target
= control target key end

     0   :  { %6 = vsyncpa [#allocation3], 0  ;;  %s448_s9 = smov [#allocation2]   ;;  %s449_s11 = smov 128   ;;  %s626_s0 = inlined_call_operand.hbm [shape: f32[16,128], index: 0, kind: input, shape index: {}]   ;;  %s627_s1 = inlined_call_operand.vmem [shape: f32[16,8], index: 1, kind: output, shape index: {}]  }
   0x1   :  { %s11_s8 = sshll.u32 %s626_s0, 4  ;;  %s13_s10 = sshll.u32 %s448_s9, 4  ;;  %s12_s8 = int_to_ptr.hbm [resolvable:$true] %s11_s8  ;;  %s14_s10 = int_to_ptr.vmem [resolvable:$true] %s13_s10 }
   0x2   :  { %s450_s12 = smov 8  }
   0x3   :  { %19 = dma.hbm_to_vmem [thread:$0]  %s12_s8, 256, %s14_s10, [#allocation3], %s449_s11, %s449_s11, %s450_s12  }
   0x4   :  { %446 = dma.done.wait [#allocation3], 256  }
   0x5   :  { %447 = vsyncadd [#allocation3], 4294967040  ;;  %vm26_vm0 = vcmask 130048   ;;  %v471_v0 = vld [vmem:[#allocation2] sm:$0xff]  ;;  %s451_s13 = smov 96   ;;  %s452_s0 = smov 112  }
   0x6   :  { %105 = vrot.lane.b32.xlu1 %v471_v0, %s451_s13  ;;  %v27_v1 = vsel %vm26_vm0, %v471_v0, 0.0  ;;  %60 = vrot.lane.b32.xlu2 %v471_v0, %s452_s0  ;;  %v479_v2 = vld [vmem:[#allocation2 + $0x8] sm:$0xff]  ;;  %s453_s14 = smov 80   ;;  %s454_s15 = smov 64   ;;  %vm55_vm1 = vcmask 7168   ;;  %vm102_vm2 = vcmask 15368  }
   0x7   :  { %28 = vadd.xlane.f32.xlu0 %v27_v1  ;;  %v30_v3 = vsel %vm26_vm0, %v479_v2, 0.0  ;;  %s455_s16 = smov 48   ;;  %s456_s17 = smov 32   ;;  %vm147_vm3 = vcmask 23568   ;;  %vm192_vm4 = vcmask 31768   ;;  %vm237_vm5 = vcmask 39968  }
   0x8   :  { %s457_s18 = smov 16   ;;  %vm282_vm6 = vcmask 48168   ;;  %vm327_vm7 = vcmask 56368   ;;  %vm372_vm8 = vcmask 64568  }
   0xe   :  { %150 = vrot.lane.b32.xlu1 %v471_v0, %s453_s14  ;;  %62 = vrot.lane.b32.xlu2 %v479_v2, %s452_s0 }
   0xf   :  { %31 = vadd.xlane.f32.xlu0 %v30_v3 }
  0x16   :  { %195 = vrot.lane.b32.xlu2 %v471_v0, %s454_s15 }
  0x23   :  { %107 = vrot.lane.b32.xlu0 %v479_v2, %s451_s13 }
  0x2b   :  { %152 = vrot.lane.b32.xlu0 %v479_v2, %s453_s14 }
  0x60   :  { %v61_v4 = vpop.permute.xlu2 %60 }
  0x61   :  { %v66_v5 = vsel %vm26_vm0, %v61_v4, 0.0 }
  0x62   :  { %67 = vadd.xlane.f32.xlu0 %v66_v5 }
  0x68   :  { %v63_v6 = vpop.permute.xlu2 %62 }
  0x69   :  { %v69_v7 = vsel %vm26_vm0, %v63_v6, 0.0 }
  0x6a   :  { %70 = vadd.xlane.f32.xlu1 %v69_v7 }
  0x70   :  { %v196_v26 = vpop.permute.xlu2 %195 }
  0x71   :  { %v201_v27 = vsel %vm26_vm0, %v196_v26, 0.0 }
  0x78   :  { %v106_v8 = vpop.permute.xlu1 %105 }
  0x79   :  { %v111_v9 = vsel %vm26_vm0, %v106_v8, 0.0 }
  0x7a   :  { %112 = vadd.xlane.f32.xlu0 %v111_v9  ;;  %v29_v12 = vpop.xlane.xlu0 %28 }
  0x7b   :  { %v33_v14 = vmul.f32 0.0625, %v29_v12 }
  0x7d   :  { %v35_v16 = vsub.f32 %v471_v0, %v33_v14 }
  0x7f   :  { %v37_v19 = vmul.f32 %v35_v16, %v35_v16 }
  0x80   :  { %v151_v10 = vpop.permute.xlu1 %150 }
  0x81   :  { %v156_v11 = vsel %vm26_vm0, %v151_v10, 0.0  ;;  %v39_v21 = vsel %vm26_vm0, %v37_v19, 0.0 }
  0x82   :  { %157 = vadd.xlane.f32.xlu0 %v156_v11  ;;  %v32_v13 = vpop.xlane.xlu0 %31 }
  0x83   :  { %v34_v18 = vmul.f32 0.0625, %v32_v13 }
  0x85   :  { %v36_v20 = vsub.f32 %v479_v2, %v34_v18 }
  0x87   :  { %v38_v22 = vmul.f32 %v36_v20, %v36_v20 }
  0x89   :  { %v42_v23 = vsel %vm26_vm0, %v38_v22, 0.0 }
  0x95   :  { %v108_v15 = vpop.permute.xlu0 %107 }
  0x96   :  { %197 = vrot.lane.b32.xlu0 %v479_v2, %s454_s15  ;;  %v114_v17 = vsel %vm26_vm0, %v108_v15, 0.0 }
  0x97   :  { %115 = vadd.xlane.f32.xlu1 %v114_v17 }
  0x9d   :  { %v153_v24 = vpop.permute.xlu0 %152 }
  0x9e   :  { %240 = vrot.lane.b32.xlu0 %v471_v0, %s455_s16  ;;  %v159_v25 = vsel %vm26_vm0, %v153_v24, 0.0 }
  0x9f   :  { %40 = vadd.xlane.f32.xlu1 %v39_v21 }
  0xa6   :  { %242 = vrot.lane.b32.xlu0 %v479_v2, %s455_s16 }
  0xa7   :  { %43 = vadd.xlane.f32.xlu1 %v42_v23 }
  0xae   :  { %287 = vrot.lane.b32.xlu0 %v479_v2, %s456_s17 }
  0xaf   :  { %160 = vadd.xlane.f32.xlu1 %v159_v25 }
  0xb6   :  { %332 = vrot.lane.b32.xlu0 %v479_v2, %s457_s18 }
  0xb7   :  { %202 = vadd.xlane.f32.xlu1 %v201_v27 }
  0xd0   :  { %285 = vrot.lane.b32.xlu1 %v471_v0, %s456_s17 }
  0xd5   :  { %v68_v28 = vpop.xlane.xlu0 %67 }
  0xd6   :  { %v72_v48 = vmul.f32 0.0625, %v68_v28 }
  0xd8   :  { %330 = vrot.lane.b32.xlu1 %v471_v0, %s457_s18  ;;  %v74_v52 = vsub.f32 %v471_v0, %v72_v48 }
  0xda   :  { %v76_v54 = vmul.f32 %v74_v52, %v74_v52 }
  0xdd   :  { %v518_v31 = vpop.xlane.xlu1 %70 }
  0xde   :  { %v73_v17 = vmul.f32 0.0625, %v518_v31 }
  0xe0   :  { %v75_v18 = vsub.f32 %v479_v2, %v73_v17 }
  0xe2   :  { %v77_v19 = vmul.f32 %v75_v18, %v75_v18 }
  0xed   :  { %v113_v29 = vpop.xlane.xlu0 %112 }
  0xee   :  { %v117_v55 = vmul.f32 0.0625, %v113_v29 }
  0xf0   :  { %v119_v59 = vsub.f32 %v471_v0, %v117_v55 }
  0xf2   :  { %v121_v61 = vmul.f32 %v119_v59, %v119_v59 }
  0xf5   :  { %v158_v30 = vpop.xlane.xlu0 %157 }
  0xf6   :  { %v162_v3 = vmul.f32 0.0625, %v158_v30 }
  0xf8   :  { %v164_v6 = vsub.f32 %v471_v0, %v162_v3 }
  0xfa   :  { %v166_v8 = vmul.f32 %v164_v6, %v164_v6 }
 0x108   :  { %v198_v32 = vpop.permute.xlu0 %197 }
 0x109   :  { %v204_v33 = vsel %vm26_vm0, %v198_v32, 0.0 }
 0x10a   :  { %v116_v34 = vpop.xlane.xlu1 %115  ;;  %205 = vadd.xlane.f32.xlu2 %v204_v33 }
 0x10b   :  { %v118_v62 = vmul.f32 0.0625, %v116_v34 }
 0x10d   :  { %v120_v63 = vsub.f32 %v479_v2, %v118_v62 }
 0x10f   :  { %v122_v4 = vmul.f32 %v120_v63, %v120_v63 }
 0x110   :  { %v241_v35 = vpop.permute.xlu0 %240 }
 0x111   :  { %v246_v36 = vsel %vm26_vm0, %v241_v35, 0.0 }
 0x112   :  { %v41_v37 = vpop.xlane.xlu1 %40  ;;  %247 = vadd.xlane.f32.xlu2 %v246_v36 }
 0x113   :  { %v45_v38 = vmul.f32 0.06666667, %v41_v37 }
 0x115   :  { %v47_v39 = vmax.f32 %v45_v38, 1e-06 }
 0x117   :  { %v49_v40 = vmin.f32 %v47_v39, 1000000.0 }
 0x118   :  { %v243_v41 = vpop.permute.xlu0 %242 }
 0x119   :  { %390 = vlog2.f32 %v49_v40  ;;  %v249_v42 = vsel %vm26_vm0, %v243_v41, 0.0 }
 0x11a   :  { %v44_v43 = vpop.xlane.xlu1 %43  ;;  %250 = vadd.xlane.f32.xlu1 %v249_v42 }
 0x11b   :  { %v46_v44 = vmul.f32 0.06666667, %v44_v43 }
 0x11d   :  { %v48_v45 = vmax.f32 %v46_v44, 1e-06 }
 0x11f   :  { %v391_v46 = vpop.eup %390  ;;  %v50_v47 = vmin.f32 %v48_v45, 1000000.0 }
 0x120   :  { %v52_v49 = vmul.f32 0.6931472, %v391_v46  ;;  %v288_v50 = vpop.permute.xlu0 %287 }
 0x121   :  { %392 = vlog2.f32 %v50_v47  ;;  %v294_v51 = vsel %vm26_vm0, %v288_v50, 0.0 }
 0x122   :  { %56 = vst.msk [vmem:[%s627_s1] sm:$0xff] %vm55_vm1, %v52_v49  ;;  %295 = vadd.xlane.f32.xlu1 %v294_v51  ;;  %v161_v60 = vpop.xlane.xlu1 %160 }
 0x123   :  { %v163_v9 = vmul.f32 0.0625, %v161_v60 }
 0x125   :  { %v165_v13 = vsub.f32 %v479_v2, %v163_v9 }
 0x127   :  { %v393_v53 = vpop.eup %392  ;;  %v167_v14 = vmul.f32 %v165_v13, %v165_v13 }
 0x128   :  { %v54_v56 = vmul.f32 0.6931472, %v393_v53  ;;  %v333_v57 = vpop.permute.xlu0 %332 }
 0x129   :  { %v339_v58 = vsel %vm26_vm0, %v333_v57, 0.0 }
 0x12a   :  { %57 = vst.msk [vmem:[%s627_s1 + $0x8] sm:$0xff] %vm55_vm1, %v54_v56  ;;  %80 = vrot.lane.b32.xlu2 %v76_v54, %s452_s0  ;;  %340 = vadd.xlane.f32.xlu1 %v339_v58  ;;  %v203_v1 = vpop.xlane.xlu1 %202 }
 0x12b   :  { %v207_v5 = vmul.f32 0.0625, %v203_v1 }
 0x12d   :  { %v209_v7 = vsub.f32 %v471_v0, %v207_v5 }
 0x12f   :  { %v211_v10 = vmul.f32 %v209_v7, %v209_v7 }
 0x132   :  { %125 = vrot.lane.b32.xlu2 %v121_v61, %s451_s13 }
 0x13a   :  { %127 = vrot.lane.b32.xlu2 %v122_v4, %s451_s13 }
 0x142   :  { %v286_v11 = vpop.permute.xlu1 %285  ;;  %170 = vrot.lane.b32.xlu2 %v166_v8, %s453_s14 }
 0x143   :  { %215 = vrot.lane.b32.xlu1 %v211_v10, %s454_s15  ;;  %v291_v12 = vsel %vm26_vm0, %v286_v11, 0.0 }
 0x144   :  { %292 = vadd.xlane.f32.xlu0 %v291_v12 }
 0x14a   :  { %v331_v15 = vpop.permute.xlu1 %330  ;;  %172 = vrot.lane.b32.xlu2 %v167_v14, %s453_s14 }
 0x14b   :  { %v336_v16 = vsel %vm26_vm0, %v331_v15, 0.0 }
 0x14c   :  { %337 = vadd.xlane.f32.xlu0 %v336_v16 }
 0x160   :  { %82 = vrot.lane.b32.xlu0 %v77_v19, %s452_s0 }
 0x17d   :  { %v206_v20 = vpop.xlane.xlu2 %205 }
 0x17e   :  { %v208_v21 = vmul.f32 0.0625, %v206_v20 }
 0x180   :  { %v210_v22 = vsub.f32 %v479_v2, %v208_v21 }
 0x182   :  { %v212_v23 = vmul.f32 %v210_v22, %v210_v22 }
 0x184   :  { %217 = vrot.lane.b32.xlu2 %v212_v23, %s454_s15 }
 0x185   :  { %v248_v24 = vpop.xlane.xlu2 %247 }
 0x186   :  { %v252_v25 = vmul.f32 0.0625, %v248_v24 }
 0x188   :  { %v254_v26 = vsub.f32 %v471_v0, %v252_v25 }
 0x18a   :  { %v256_v27 = vmul.f32 %v254_v26, %v254_v26 }
 0x18c   :  { %260 = vrot.lane.b32.xlu0 %v256_v27, %s455_s16 }
 0x18d   :  { %v251_v28 = vpop.xlane.xlu1 %250  ;;  %v81_v36 = vpop.permute.xlu2 %80 }
 0x18e   :  { %v253_v29 = vmul.f32 0.0625, %v251_v28  ;;  %v86_v52 = vsel %vm26_vm0, %v81_v36, 0.0 }
 0x190   :  { %v255_v30 = vsub.f32 %v479_v2, %v253_v29 }
 0x192   :  { %v257_v31 = vmul.f32 %v255_v30, %v255_v30 }
 0x194   :  { %262 = vrot.lane.b32.xlu2 %v257_v31, %s455_s16 }
 0x195   :  { %v296_v32 = vpop.xlane.xlu1 %295  ;;  %v126_v37 = vpop.permute.xlu2 %125 }
 0x196   :  { %v298_v33 = vmul.f32 0.0625, %v296_v32 }
 0x198   :  { %v300_v34 = vsub.f32 %v479_v2, %v298_v33 }
 0x19a   :  { %v302_v35 = vmul.f32 %v300_v34, %v300_v34 }
 0x19c   :  { %307 = vrot.lane.b32.xlu1 %v302_v35, %s456_s17 }
 0x19d   :  { %v128_v38 = vpop.permute.xlu2 %127  ;;  %v341_v41 = vpop.xlane.xlu1 %340 }
 0x19e   :  { %v343_v42 = vmul.f32 0.0625, %v341_v41  ;;  %v134_v58 = vsel %vm26_vm0, %v128_v38, 0.0 }
 0x1a0   :  { %v345_v45 = vsub.f32 %v479_v2, %v343_v42 }
 0x1a2   :  { %v347_v49 = vmul.f32 %v345_v45, %v345_v45 }
 0x1a5   :  { %v171_v47 = vpop.permute.xlu2 %170 }
 0x1a6   :  { %v176_v59 = vsel %vm26_vm0, %v171_v47, 0.0 }
 0x1ad   :  { %v173_v53 = vpop.permute.xlu2 %172 }
 0x1ae   :  { %v179_v54 = vsel %vm26_vm0, %v173_v53, 0.0 }
 0x1b5   :  { %v216_v2 = vpop.permute.xlu1 %215 }
 0x1b6   :  { %v221_v55 = vsel %vm26_vm0, %v216_v2, 0.0 }
 0x1b7   :  { %v293_v39 = vpop.xlane.xlu0 %292 }
 0x1b8   :  { %v297_v40 = vmul.f32 0.0625, %v293_v39 }
 0x1ba   :  { %v299_v43 = vsub.f32 %v471_v0, %v297_v40 }
 0x1bc   :  { %v301_v44 = vmul.f32 %v299_v43, %v299_v43 }
 0x1be   :  { %305 = vrot.lane.b32.xlu0 %v301_v44, %s456_s17 }
 0x1bf   :  { %v338_v46 = vpop.xlane.xlu0 %337 }
 0x1c0   :  { %v342_v48 = vmul.f32 0.0625, %v338_v46 }
 0x1c2   :  { %v344_v50 = vsub.f32 %v471_v0, %v342_v48  ;;  %v131_v0 = vsel %vm26_vm0, %v126_v37, 0.0 }
 0x1c4   :  { %v346_v51 = vmul.f32 %v344_v50, %v344_v50 }
 0x1c6   :  { %87 = vadd.xlane.f32.xlu1 %v86_v52  ;;  %352 = vrot.lane.b32.xlu0 %v347_v49, %s457_s18 }
 0x1c7   :  { %350 = vrot.lane.b32.xlu2 %v346_v51, %s457_s18 }
 0x1ce   :  { %180 = vadd.xlane.f32.xlu1 %v179_v54 }
 0x1d2   :  { %v83_v56 = vpop.permute.xlu0 %82 }
 0x1d3   :  { %v89_v57 = vsel %vm26_vm0, %v83_v56, 0.0 }
 0x1d6   :  { %222 = vadd.xlane.f32.xlu1 %v221_v55 }
 0x1de   :  { %v218_v60 = vpop.permute.xlu2 %217 }
 0x1df   :  { %v224_v61 = vsel %vm26_vm0, %v218_v60, 0.0 }
 0x1ee   :  { %v263_v1 = vpop.permute.xlu2 %262 }
 0x1ef   :  { %v269_v3 = vsel %vm26_vm0, %v263_v1, 0.0 }
 0x1f0   :  { %90 = vadd.xlane.f32.xlu2 %v89_v57  ;;  %132 = vadd.xlane.f32.xlu0 %v131_v0 }
 0x1f8   :  { %135 = vadd.xlane.f32.xlu2 %v134_v58  ;;  %177 = vadd.xlane.f32.xlu0 %v176_v59 }
 0x1fe   :  { %v261_v62 = vpop.permute.xlu0 %260 }
 0x1ff   :  { %v266_v63 = vsel %vm26_vm0, %v261_v62, 0.0 }
 0x200   :  { %225 = vadd.xlane.f32.xlu0 %v224_v61  ;;  %267 = vadd.xlane.f32.xlu1 %v266_v63 }
 0x208   :  { %270 = vadd.xlane.f32.xlu1 %v269_v3 }
 0x20e   :  { %v308_v4 = vpop.permute.xlu1 %307 }
 0x20f   :  { %v314_v5 = vsel %vm26_vm0, %v308_v4, 0.0 }
 0x210   :  { %315 = vadd.xlane.f32.xlu0 %v314_v5 }
 0x221   :  { %v351_v6 = vpop.permute.xlu2 %350 }
 0x222   :  { %v356_v7 = vsel %vm26_vm0, %v351_v6, 0.0 }
 0x223   :  { %357 = vadd.xlane.f32.xlu1 %v356_v7 }
 0x230   :  { %v306_v8 = vpop.permute.xlu0 %305 }
 0x231   :  { %v311_v9 = vsel %vm26_vm0, %v306_v8, 0.0 }
 0x232   :  { %312 = vadd.xlane.f32.xlu2 %v311_v9 }
 0x238   :  { %v353_v10 = vpop.permute.xlu0 %352 }
 0x239   :  { %v88_v11 = vpop.xlane.xlu1 %87  ;;  %v359_v12 = vsel %vm26_vm0, %v353_v10, 0.0 }
 0x23a   :  { %v92_v13 = vmul.f32 0.06666667, %v88_v11  ;;  %360 = vadd.xlane.f32.xlu2 %v359_v12 }
 0x23c   :  { %v94_v14 = vmax.f32 %v92_v13, 1e-06 }
 0x23e   :  { %v96_v15 = vmin.f32 %v94_v14, 1000000.0 }
 0x240   :  { %394 = vlog2.f32 %v96_v15 }
 0x241   :  { %v181_v18 = vpop.xlane.xlu1 %180 }
 0x242   :  { %v183_v22 = vmul.f32 0.06666667, %v181_v18 }
 0x244   :  { %v185_v28 = vmax.f32 %v183_v22, 1e-06 }
 0x246   :  { %v395_v16 = vpop.eup %394  ;;  %v187_v34 = vmin.f32 %v185_v28, 1000000.0 }
 0x247   :  { %v99_v17 = vmul.f32 0.6931472, %v395_v16 }
 0x249   :  { %103 = vst.msk [vmem:[%s627_s1] sm:$0xff] %vm102_vm2, %v99_v17  ;;  %v223_v19 = vpop.xlane.xlu1 %222 }
 0x24a   :  { %v227_v25 = vmul.f32 0.06666667, %v223_v19 }
 0x24c   :  { %v229_v31 = vmax.f32 %v227_v25, 1e-06 }
 0x24e   :  { %v231_v37 = vmin.f32 %v229_v31, 1000000.0 }
 0x263   :  { %v91_v20 = vpop.xlane.xlu2 %90  ;;  %v133_v21 = vpop.xlane.xlu0 %132 }
 0x264   :  { %v93_v23 = vmul.f32 0.06666667, %v91_v20  ;;  %v137_v24 = vmul.f32 0.06666667, %v133_v21 }
 0x266   :  { %v95_v26 = vmax.f32 %v93_v23, 1e-06  ;;  %v139_v27 = vmax.f32 %v137_v24, 1e-06 }
 0x268   :  { %v97_v29 = vmin.f32 %v95_v26, 1000000.0  ;;  %v141_v30 = vmin.f32 %v139_v27, 1000000.0 }
 0x26a   :  { %396 = vlog2.f32 %v97_v29 }
 0x26b   :  { %398 = vlog2.f32 %v141_v30  ;;  %v136_v32 = vpop.xlane.xlu2 %135  ;;  %v178_v33 = vpop.xlane.xlu0 %177 }
 0x26c   :  { %v138_v35 = vmul.f32 0.06666667, %v136_v32  ;;  %v182_v36 = vmul.f32 0.06666667, %v178_v33  ;;  %400 = vlog2.f32 %v187_v34 }
 0x26d   :  { %402 = vlog2.f32 %v231_v37 }
 0x26e   :  { %v140_v38 = vmax.f32 %v138_v35, 1e-06  ;;  %v184_v39 = vmax.f32 %v182_v36, 1e-06 }
 0x270   :  { %v397_v40 = vpop.eup %396  ;;  %v142_v41 = vmin.f32 %v140_v38, 1000000.0  ;;  %v186_v42 = vmin.f32 %v184_v39, 1000000.0 }
 0x271   :  { %v399_v43 = vpop.eup %398  ;;  %v101_v44 = vmul.f32 0.6931472, %v397_v40 }
 0x272   :  { %v144_v45 = vmul.f32 0.6931472, %v399_v43  ;;  %404 = vlog2.f32 %v142_v41  ;;  %v401_v50 = vpop.eup %400 }
 0x273   :  { %104 = vst.msk [vmem:[%s627_s1 + $0x8] sm:$0xff] %vm102_vm2, %v101_v44  ;;  %406 = vlog2.f32 %v186_v42  ;;  %v226_v46 = vpop.xlane.xlu0 %225  ;;  %v268_v47 = vpop.xlane.xlu1 %267  ;;  %v191_v58 = vmul.f32 0.6931472, %v401_v50 }
 0x274   :  { %148 = vst.msk [vmem:[%s627_s1] sm:$0xff] %vm147_vm3, %v144_v45  ;;  %v228_v48 = vmul.f32 0.06666667, %v226_v46  ;;  %v272_v49 = vmul.f32 0.06666667, %v268_v47  ;;  %v403_v53 = vpop.eup %402 }
 0x275   :  { %v234_v60 = vmul.f32 0.6931472, %v403_v53 }
 0x276   :  { %v230_v51 = vmax.f32 %v228_v48, 1e-06  ;;  %v274_v52 = vmax.f32 %v272_v49, 1e-06 }
 0x278   :  { %v405_v54 = vpop.eup %404  ;;  %v232_v2 = vmin.f32 %v230_v51, 1000000.0  ;;  %v276_v55 = vmin.f32 %v274_v52, 1000000.0 }
 0x279   :  { %v407_v56 = vpop.eup %406  ;;  %v146_v57 = vmul.f32 0.6931472, %v405_v54 }
 0x27a   :  { %v189_v0 = vmul.f32 0.6931472, %v407_v56  ;;  %408 = vlog2.f32 %v232_v2 }
 0x27b   :  { %149 = vst.msk [vmem:[%s627_s1 + $0x8] sm:$0xff] %vm147_vm3, %v146_v57  ;;  %410 = vlog2.f32 %v276_v55  ;;  %v271_v59 = vpop.xlane.xlu1 %270 }
 0x27c   :  { %193 = vst.msk [vmem:[%s627_s1] sm:$0xff] %vm192_vm4, %v189_v0  ;;  %v273_v61 = vmul.f32 0.06666667, %v271_v59 }
 0x27d   :  { %194 = vst.msk [vmem:[%s627_s1 + $0x8] sm:$0xff] %vm192_vm4, %v191_v58 }
 0x27e   :  { %238 = vst.msk [vmem:[%s627_s1] sm:$0xff] %vm237_vm5, %v234_v60  ;;  %v275_v62 = vmax.f32 %v273_v61, 1e-06 }
 0x280   :  { %v409_v63 = vpop.eup %408  ;;  %v277_v1 = vmin.f32 %v275_v62, 1000000.0 }
 0x281   :  { %v411_v3 = vpop.eup %410  ;;  %v236_v4 = vmul.f32 0.6931472, %v409_v63 }
 0x282   :  { %v279_v5 = vmul.f32 0.6931472, %v411_v3  ;;  %412 = vlog2.f32 %v277_v1 }
 0x283   :  { %239 = vst.msk [vmem:[%s627_s1 + $0x8] sm:$0xff] %vm237_vm5, %v236_v4  ;;  %v316_v6 = vpop.xlane.xlu0 %315 }
 0x284   :  { %283 = vst.msk [vmem:[%s627_s1] sm:$0xff] %vm282_vm6, %v279_v5  ;;  %v318_v8 = vmul.f32 0.06666667, %v316_v6 }
 0x286   :  { %v320_v10 = vmax.f32 %v318_v8, 1e-06 }
 0x288   :  { %v413_v7 = vpop.eup %412  ;;  %v322_v11 = vmin.f32 %v320_v10, 1000000.0 }
 0x289   :  { %v281_v9 = vmul.f32 0.6931472, %v413_v7 }
 0x28a   :  { %414 = vlog2.f32 %v322_v11 }
 0x28b   :  { %284 = vst.msk [vmem:[%s627_s1 + $0x8] sm:$0xff] %vm282_vm6, %v281_v9 }
 0x290   :  { %v415_v12 = vpop.eup %414 }
 0x291   :  { %v326_v13 = vmul.f32 0.6931472, %v415_v12 }
 0x293   :  { %329 = vst.msk [vmem:[%s627_s1 + $0x8] sm:$0xff] %vm327_vm7, %v326_v13 }
 0x296   :  { %v358_v14 = vpop.xlane.xlu1 %357 }
 0x297   :  { %v362_v15 = vmul.f32 0.06666667, %v358_v14 }
 0x299   :  { %v364_v16 = vmax.f32 %v362_v15, 1e-06 }
 0x29b   :  { %v366_v18 = vmin.f32 %v364_v16, 1000000.0 }
 0x29d   :  { %416 = vlog2.f32 %v366_v18 }
 0x2a3   :  { %v417_v24 = vpop.eup %416 }
 0x2a4   :  { %v369_v27 = vmul.f32 0.6931472, %v417_v24 }
 0x2a5   :  { %v313_v17 = vpop.xlane.xlu2 %312 }
 0x2a6   :  { %v317_v19 = vmul.f32 0.06666667, %v313_v17 }
 0x2a8   :  { %v319_v20 = vmax.f32 %v317_v19, 1e-06 }
 0x2aa   :  { %v321_v21 = vmin.f32 %v319_v20, 1000000.0 }
 0x2ac   :  { %418 = vlog2.f32 %v321_v21 }
 0x2ad   :  { %v361_v22 = vpop.xlane.xlu2 %360 }
 0x2ae   :  { %v363_v23 = vmul.f32 0.06666667, %v361_v22 }
 0x2b0   :  { %v365_v25 = vmax.f32 %v363_v23, 1e-06 }
 0x2b2   :  { %v419_v26 = vpop.eup %418  ;;  %v367_v28 = vmin.f32 %v365_v25, 1000000.0 }
 0x2b3   :  { %v324_v29 = vmul.f32 0.6931472, %v419_v26 }
 0x2b4   :  { %420 = vlog2.f32 %v367_v28 }
 0x2b5   :  { %328 = vst.msk [vmem:[%s627_s1] sm:$0xff] %vm327_vm7, %v324_v29 }
 0x2b6   :  { %373 = vst.msk [vmem:[%s627_s1] sm:$0xff] %vm372_vm8, %v369_v27 }
 0x2ba   :  { %v421_v30 = vpop.eup %420 }
 0x2bb   :  { %v371_v31 = vmul.f32 0.6931472, %v421_v30 }
 0x2bd   :  { %374 = vst.msk [vmem:[%s627_s1 + $0x8] sm:$0xff] %vm372_vm8, %v371_v31 }
 0x2be   :  { %379 = vsyncpa [#allocation3], 1 }

</bundles_post_ra>
